<compile_context>
chip_gen: v6e
topology: v6e:2x2x1
jax: 0.10.0
libtpu: 0.0.40
codegen_flags: <defaults>
</compile_context>

<pallas_src>
import functools

import jax
import jax.numpy as jnp
from jax import lax
from jax.experimental import pallas as pl
from jax.experimental.pallas import tpu as pltpu

_LANE = 128     # lane width (last-dim alignment)
_SUBLANE = 8    # f32 sublane packing


def _round_up(x, m):
    return (x + m - 1) // m * m


def _gumbel_softmax_kernel(logits_ref, bits_ref, out_ref, *, tau, hard):
    """One (block_rows, V) tile: Gumbel-softmax along the lane (vocab) axis."""
    logits = logits_ref[...].astype(jnp.float32)

    # Uniform(0,1) from raw 32-bit noise: 24 mantissa-sized bits + 0.5 offset
    # keeps u strictly inside (0,1), so log(u) is finite.
    bits = bits_ref[...]
    u = (jnp.bitwise_and(bits, jnp.uint32(0x00FFFFFF)).astype(jnp.float32) + 0.5) * (
        1.0 / 16777216.0
    )
    # PyTorch: gumbels = -Exponential(1).log() = -log(-log(U))
    gumbels = -jnp.log(-jnp.log(u))

    y = (logits + gumbels) * (1.0 / tau)
    m = jnp.max(y, axis=-1, keepdims=True)  # XLU lane reduce

    if hard:
        # One-hot at the first argmax of y. PyTorch's straight-through forward
        # value (y_hard - y_soft.detach() + y_soft) equals y_hard to <= 1 ulp,
        # so the softmax (exp + sum + divide) is skipped entirely.
        col = lax.broadcasted_iota(jnp.int32, y.shape, y.ndim - 1)
        big = jnp.iinfo(jnp.int32).max
        idx = jnp.min(jnp.where(y == m, col, big), axis=-1, keepdims=True)
        out_ref[...] = (col == idx).astype(out_ref.dtype)
    else:
        e = jnp.exp(y - m)
        denom = jnp.sum(e, axis=-1, keepdims=True)
        out_ref[...] = (e * (1.0 / denom)).astype(out_ref.dtype)


def _pick_block_rows(batch, vocab, in_bytes, out_bytes, vmem_budget=40 << 20):
    # Per row of tile: double-buffered HBM tiles (logits + u32 bits in, out)
    # plus ~6 live f32 full-width temporaries inside the kernel.
    per_row = 2 * vocab * (in_bytes + 4) + 2 * vocab * out_bytes + 6 * vocab * 4
    rows = vmem_budget // max(per_row, 1)
    rows = max(_SUBLANE, min(512, (rows // _SUBLANE) * _SUBLANE))
    rows = min(rows, _round_up(batch, _SUBLANE))
    return int(rows)


def gumbel_softmax_pallas(next_token_logits, key, tau=1.0, hard=True,
                          block_rows=None):
    B, V = next_token_logits.shape
    out_dtype = next_token_logits.dtype

    in_bytes = jnp.dtype(next_token_logits.dtype).itemsize
    out_bytes = jnp.dtype(out_dtype).itemsize
    if block_rows is None:
        block_rows = _pick_block_rows(B, V, in_bytes, out_bytes)

    # Lane-dense, tile-aligned padding: vocab -> multiple of 128 (pad with -inf
    # so padded columns never win the argmax and contribute 0 to the softmax),
    # batch -> multiple of block_rows (padded rows are sliced away).
    V_pad = _round_up(V, _LANE)
    B_pad = _round_up(B, block_rows)

    x = next_token_logits
    if V_pad != V:
        x = jnp.pad(x, ((0, 0), (0, V_pad - V)), constant_values=-jnp.inf)
    if B_pad != B:
        x = jnp.pad(x, ((0, B_pad - B), (0, 0)), constant_values=0.0)

    # Gumbel noise bits (in-kernel pltpu.prng_* has no CPU/interpret lowering).
    bits = jax.random.bits(key, (B_pad, V_pad), dtype=jnp.uint32)

    kernel = functools.partial(_gumbel_softmax_kernel,
                               tau=float(tau), hard=bool(hard))
    out = pl.pallas_call(
        kernel,
        out_shape=jax.ShapeDtypeStruct((B_pad, V_pad), out_dtype),
        grid=(B_pad // block_rows,),
        in_specs=[
            pl.BlockSpec((block_rows, V_pad), lambda i: (i, 0)),
            pl.BlockSpec((block_rows, V_pad), lambda i: (i, 0)),
        ],
        out_specs=pl.BlockSpec((block_rows, V_pad), lambda i: (i, 0)),
        compiler_params=pltpu.CompilerParams(
            dimension_semantics=("parallel",),  # independent row tiles -> both v7x TCs
            vmem_limit_bytes=64 << 20,
        ),
    )(x, bits)

    if B_pad != B or V_pad != V:
        out = out[:B, :V]
    return out


class GubleLogitsProcessor:
    """JAX/Pallas port of the PyTorch GubleLogitsProcessor (no learned params)."""

    # TODO(synk): straight-through gradient (y_hard - y_soft.detach() + y_soft)
    # is not differentiable through pallas_call; forward-only here. Wrap with
    # jax.custom_vjp (soft-softmax backward) if gradients are needed.

    def __init__(self, temperature: float = 1.0, hard: bool = True):
        self.temperature = temperature
        self.hard = hard

    def __call__(self, scores, next_token_logits, key=None, seed=0):
        del scores  # intentionally unused, matching the PyTorch forward
        if key is None:
            key = jax.random.PRNGKey(seed)
        return gumbel_softmax_pallas(
            next_token_logits, key, tau=self.temperature, hard=self.hard
        )


if __name__ == "__main__":
    key = jax.random.PRNGKey(0)
    B, V = 8, 256  # small (batch, vocab)
    k1, k2, k3 = jax.random.split(key, 3)
    scores = jax.random.normal(k1, (B, V), dtype=jnp.float32)  # unused
    next_token_logits = jax.random.normal(k2, (B, V), dtype=jnp.float32)

    # hard=True (default) path: one-hot rows
    proc_hard = GubleLogitsProcessor(temperature=1.0, hard=True)
    out_hard = jax.block_until_ready(proc_hard(scores, next_token_logits, key=k3))
    assert out_hard.shape == (B, V) and out_hard.dtype == next_token_logits.dtype
    assert bool(jnp.allclose(jnp.sum(out_hard, axis=-1), 1.0, atol=1e-3))
    assert bool(jnp.all(jnp.sum(out_hard > 0.5, axis=-1) == 1))

    # hard=False path: proper probability rows
    proc_soft = GubleLogitsProcessor(temperature=0.7, hard=False)
    out_soft = jax.block_until_ready(proc_soft(scores, next_token_logits, key=k3))
    assert out_soft.shape == (B, V)
    assert bool(jnp.allclose(jnp.sum(out_soft, axis=-1), 1.0, atol=1e-3))
    assert bool(jnp.all((out_soft >= 0.0) & (out_soft <= 1.0)))

    print("KERNEL_OK")
</pallas_src>

<mosaic_0001>
module attributes {stable_mosaic.version = 11 : i64} {
  func.func @_gumbel_softmax_kernel(%arg0: i32, %arg1: memref<8x256xf32, #tpu.memory_space<vmem>>, %arg2: memref<8x256xi32, #tpu.memory_space<vmem>>, %arg3: memref<8x256xf32, #tpu.memory_space<vmem>>) attributes {dimension_semantics = [#tpu.dimension_semantics<parallel>], iteration_bounds = array<i64: 1>, scalar_prefetch = 0 : i64, scratch_operands = 0 : i64, tpu.core_type = #tpu.core_type<tc>, window_params = [{transform_indices = @transform_0, window_bounds = array<i64: 8, 256>}, {transform_indices = @transform_1, window_bounds = array<i64: 8, 256>}, {transform_indices = @transform_2, window_bounds = array<i64: 8, 256>}]} {
    %c0 = arith.constant 0 : index
    %c0_0 = arith.constant 0 : index
    %0 = vector.load %arg1[%c0, %c0_0] : memref<8x256xf32, #tpu.memory_space<vmem>>, vector<8x256xf32>
    %c0_1 = arith.constant 0 : index
    %c0_2 = arith.constant 0 : index
    %1 = vector.load %arg2[%c0_1, %c0_2] : memref<8x256xi32, #tpu.memory_space<vmem>>, vector<8x256xi32>
    %c16777215_i32 = arith.constant 16777215 : i32
    %2 = vector.broadcast %c16777215_i32 : i32 to vector<8x256xi32>
    %3 = arith.andi %1, %2 : vector<8x256xi32>
    %4 = arith.uitofp %3 : vector<8x256xi32> to vector<8x256xf32>
    %cst = arith.constant 5.000000e-01 : f32
    %5 = vector.broadcast %cst : f32 to vector<8x256xf32>
    %6 = arith.addf %4, %5 : vector<8x256xf32>
    %cst_3 = arith.constant 5.96046448E-8 : f32
    %7 = vector.broadcast %cst_3 : f32 to vector<8x256xf32>
    %8 = arith.mulf %6, %7 : vector<8x256xf32>
    %9 = math.log %8 : vector<8x256xf32>
    %cst_4 = arith.constant 0.000000e+00 : f32
    %10 = vector.broadcast %cst_4 : f32 to vector<8x256xf32>
    %11 = arith.subf %10, %9 : vector<8x256xf32>
    %12 = math.log %11 : vector<8x256xf32>
    %cst_5 = arith.constant 0.000000e+00 : f32
    %13 = vector.broadcast %cst_5 : f32 to vector<8x256xf32>
    %14 = arith.subf %13, %12 : vector<8x256xf32>
    %15 = arith.addf %0, %14 : vector<8x256xf32>
    %cst_6 = arith.constant 1.000000e+00 : f32
    %16 = vector.broadcast %cst_6 : f32 to vector<8x256xf32>
    %17 = arith.mulf %15, %16 : vector<8x256xf32>
    %cst_7 = arith.constant dense<0xFF800000> : vector<8xf32>
    %18 = vector.multi_reduction <maximumf>, %17, %cst_7 [1] : vector<8x256xf32> to vector<8xf32>
    %19 = vector.shape_cast %18 : vector<8xf32> to vector<8x1xf32>
    %20 = tpu.iota {dimensions = array<i32: 1>} : vector<8x256xi32>
    %21 = vector.broadcast %19 : vector<8x1xf32> to vector<8x256xf32>
    %22 = arith.cmpf oeq, %17, %21 : vector<8x256xf32>
    %c2147483647_i32 = arith.constant 2147483647 : i32
    %23 = vector.broadcast %c2147483647_i32 : i32 to vector<8x256xi32>
    %24 = arith.select %22, %20, %23 : vector<8x256xi1>, vector<8x256xi32>
    %cst_8 = arith.constant dense<2147483647> : vector<8xi32>
    %25 = vector.multi_reduction <minsi>, %24, %cst_8 [1] : vector<8x256xi32> to vector<8xi32>
    %26 = vector.shape_cast %25 : vector<8xi32> to vector<8x1xi32>
    %27 = vector.broadcast %26 : vector<8x1xi32> to vector<8x256xi32>
    %28 = arith.cmpi eq, %20, %27 : vector<8x256xi32>
    %29 = arith.extui %28 : vector<8x256xi1> to vector<8x256xi32>
    %30 = arith.sitofp %29 : vector<8x256xi32> to vector<8x256xf32>
    %c0_9 = arith.constant 0 : index
    %c0_10 = arith.constant 0 : index
    %31 = vector.load %arg3[%c0_9, %c0_10] : memref<8x256xf32, #tpu.memory_space<vmem>>, vector<8x256xf32>
    tpu.vector_store %arg3[%c0_9, %c0_10], %30 {strides = array<i32>} : memref<8x256xf32, #tpu.memory_space<vmem>>, vector<8x256xf32>,
    return
  }
  func.func @transform_0(%arg0: i32) -> (i32, i32) {
    %c0_i32 = arith.constant 0 : i32
    %c0_i32_0 = arith.constant 0 : i32
    return %arg0, %c0_i32 : i32, i32
  }
  func.func @transform_1(%arg0: i32) -> (i32, i32) {
    %c0_i32 = arith.constant 0 : i32
    %c0_i32_0 = arith.constant 0 : i32
    return %arg0, %c0_i32 : i32, i32
  }
  func.func @transform_2(%arg0: i32) -> (i32, i32) {
    %c0_i32 = arith.constant 0 : i32
    %c0_i32_0 = arith.constant 0 : i32
    return %arg0, %c0_i32 : i32, i32
  }
}

</mosaic_0001>

<bundles_post_ra>
// kernel: tpu_custom_call.1
= control target key start
LH: loop header
LB: loop body
LE: loop exit
PB: predicated region body
PF: predicated region fallthrough
CT: control target
= control target key end

     0   :  { %7 = vsyncpa [#allocation3], 0  ;;  %s230_s0 = inlined_call_operand.hbm [shape: f32[8,256], index: 0, kind: input, shape index: {}]   ;;  %s231_s1 = inlined_call_operand.hbm [shape: u32[8,256], index: 1, kind: input, shape index: {}]   ;;  %s232_s2 = inlined_call_operand.hbm [shape: f32[8,256], index: 2, kind: output, shape index: {}]  }
   0x1   :  { %8 = vsyncpa [#allocation6], 0 }
   0x2   :  { %9 = vsyncpa [#allocation4], 0  ;;  %s202_s9 = smov [#allocation2]   ;;  %s203_s11 = smov [#allocation5]  }
   0x3   :  { %s16_s10 = sshll.u32 %s202_s9, 4  ;;  %s26_s12 = sshll.u32 %s203_s11, 4  ;;  %s17_s10 = int_to_ptr.vmem [resolvable:$true] %s16_s10  ;;  %s27_s12 = int_to_ptr.vmem [resolvable:$true] %s26_s12 }
   0x4   :  { %s144_s13 = scalar_lea.vmem %s17_s10, 256  ;;  %p149_p1 = scmp.lt.s32.totalorder %s17_s10, %s17_s10 }
   0x5   :  { %p145_p0 = scmp.ne.s32.totalorder %s17_s10, %s144_s13  ;;  %p150_p2 = scmp.lt.s32.totalorder %s144_s13, %s144_s13 }
   0x7   :  { %p151_p3 = por %p150_p2, %p149_p1 }
   0x9   :  { %p152_p4 = pnand %p151_p3, %p145_p0 }
   0xb   :  { %155 = shalt.err (!%p152_p4)
}
   0xc   :  { %19 = dma.hbm_to_vmem [thread:$0]  %s230_s0, 256, %s17_s10, [#allocation3]  }
   0xd   :  { %s164_s16 = scalar_lea.vmem %s27_s12, 256  ;;  %p169_p6 = scmp.lt.s32.totalorder %s27_s12, %s27_s12 }
   0xe   :  { %p165_p5 = scmp.ne.s32.totalorder %s27_s12, %s164_s16  ;;  %p170_p7 = scmp.lt.s32.totalorder %s164_s16, %s164_s16 }
  0x10   :  { %p171_p8 = por %p170_p7, %p169_p6 }
  0x12   :  { %p172_p9 = pnand %p171_p8, %p165_p5 }
  0x14   :  { %175 = shalt.err (!%p172_p9)
}
  0x15   :  { %29 = dma.hbm_to_vmem [thread:$0]  %s231_s1, 256, %s27_s12, [#allocation6]  }
  0x16   :  { %196 = dma.done.wait [#allocation3], 256  }
  0x17   :  { %197 = vsyncadd [#allocation3], 4294967040 }
  0x18   :  { %198 = dma.done.wait [#allocation6], 256  }
  0x19   :  { %199 = vsyncadd [#allocation6], 4294967040  ;;  %v38_v0 = vld [vmem:[#allocation5] sm:$0xff]  ;;  %v39_v1 = vld [vmem:[#allocation5 + $0x8] sm:$0xff]  ;;  %v75_v37 = vlaneseq  ;;  %s204_s0 = smov [#allocation7]   ;;  %v205_v55 = vmov 0.0  }
  0x1a   :  { %v40_v2 = vand.u32 16777215, %v38_v0  ;;  %v41_v3 = vand.u32 16777215, %v39_v1  ;;  %v36_v29 = vld [vmem:[#allocation2] sm:$0xff]  ;;  %v37_v31 = vld [vmem:[#allocation2 + $0x8] sm:$0xff] }
  0x1b   :  { %v76_v38 = vand.u32 127, %v75_v37  ;;  %s112_s1 = sshll.u32 %s204_s0, 4  ;;  %s113_s1 = int_to_ptr.vmem [resolvable:$true] %s112_s1 }
  0x1c   :  { %v42_v4 = vshrl.u32 %v40_v2, 16  ;;  %v43_v5 = vand.u32 65535, %v40_v2  ;;  %v48_v6 = vshrl.u32 %v41_v3, 16  ;;  %v49_v7 = vand.u32 65535, %v41_v3  ;;  %s176_s19 = scalar_lea.vmem %s113_s1, 256  ;;  %p181_p11 = scmp.lt.s32.totalorder %s113_s1, %s113_s1 }
  0x1d   :  { %v77_v39 = vadd.s32 128, %v76_v38  ;;  %p177_p10 = scmp.ne.s32.totalorder %s113_s1, %s176_s19  ;;  %p182_p12 = scmp.lt.s32.totalorder %s176_s19, %s176_s19 }
  0x1e   :  { %v44_v8 = vcvt.s32.f32 %v42_v4  ;;  %v46_v9 = vcvt.s32.f32 %v43_v5  ;;  %v50_v10 = vcvt.s32.f32 %v48_v6  ;;  %v52_v11 = vcvt.s32.f32 %v49_v7 }
  0x1f   :  { %p183_p13 = por %p182_p12, %p181_p11 }
  0x20   :  { %v45_v12 = vmul.f32 65536.0, %v44_v8  ;;  %v51_v13 = vmul.f32 65536.0, %v50_v10 }
  0x21   :  { %p184_p0 = pnand %p183_p13, %p177_p10 }
  0x22   :  { %v47_v14 = vadd.f32 %v46_v9, %v45_v12  ;;  %v53_v15 = vadd.f32 %v52_v11, %v51_v13 }
  0x24   :  { %v54_v16 = vadd.f32 0.5, %v47_v14  ;;  %v55_v17 = vadd.f32 0.5, %v53_v15 }
  0x26   :  { %v56_v18 = vmul.f32 5.9604645e-08, %v54_v16  ;;  %v57_v19 = vmul.f32 5.9604645e-08, %v55_v17 }
  0x28   :  { %128 = vlog2.f32 %v56_v18 }
  0x29   :  { %130 = vlog2.f32 %v57_v19 }
  0x35   :  { %v129_v20 = vpop.eup %128 }
  0x36   :  { %v131_v21 = vpop.eup %130  ;;  %v59_v22 = vmul.f32 0.6931472, %v129_v20 }
  0x37   :  { %v61_v23 = vmul.f32 0.6931472, %v131_v21 }
  0x38   :  { %v62_v24 = vsub.f32 0.0, %v59_v22 }
  0x39   :  { %v63_v25 = vsub.f32 0.0, %v61_v23 }
  0x3a   :  { %132 = vlog2.f32 %v62_v24 }
  0x3b   :  { %134 = vlog2.f32 %v63_v25 }
  0x47   :  { %v133_v26 = vpop.eup %132 }
  0x48   :  { %v135_v27 = vpop.eup %134  ;;  %v65_v28 = vmul.f32 0.6931472, %v133_v26 }
  0x49   :  { %v67_v30 = vmul.f32 0.6931472, %v135_v27 }
  0x4a   :  { %v68_v32 = vsub.f32 0.0, %v65_v28 }
  0x4b   :  { %v69_v33 = vsub.f32 0.0, %v67_v30 }
  0x4c   :  { %v70_v34 = vadd.f32 %v68_v32, %v36_v29 }
  0x4d   :  { %v71_v35 = vadd.f32 %v69_v33, %v37_v31 }
  0x4f   :  { %v72_v36 = vmax.f32 %v70_v34, %v71_v35 }
  0x51   :  { %73 = vmax.xlane.f32.xlu0 %v72_v36 }
  0xda   :  { %v74_v40 = vpop.xlane.xlu0 %73 }
  0xdb   :  { %vm78_vm0 = vcmp.eq.f32.partialorder %v70_v34, %v74_v40  ;;  %vm79_vm1 = vcmp.eq.f32.partialorder %v71_v35, %v74_v40 }
  0xdc   :  { %v80_v41 = vsel %vm78_vm0, %v76_v38, 2147483647  ;;  %v81_v42 = vsel %vm79_vm1, %v77_v39, 2147483647 }
  0xdd   :  { %vm82_vm2 = vcmp.lt.s32.totalorder %v80_v41, %v81_v42 }
  0xde   :  { %v83_v43 = vsel %vm82_vm2, %v80_v41, %v81_v42 }
  0xdf   :  { %v85_v44 = vshra.s32 %v83_v43, 16  ;;  %v84_v46 = vand.u32 65535, %v83_v43 }
  0xe1   :  { %v87_v45 = vcvt.s32.f32 %v85_v44  ;;  %v86_v48 = vcvt.s32.f32 %v84_v46 }
  0xe3   :  { %88 = vmin.xlane.f32.xlu0 %v87_v45 }
 0x16c   :  { %v89_v47 = vpop.xlane.xlu0 %88 }
 0x16d   :  { %vm90_vm3 = vcmp.eq.f32.partialorder %v87_v45, %v89_v47  ;;  %v95_v50 = vcvt.f32.s32 %v89_v47 }
 0x16e   :  { %v91_v49 = vsel %vm90_vm3, %v86_v48, inf }
 0x16f   :  { %92 = vmin.xlane.f32.xlu1 %v91_v49  ;;  %v96_v52 = vshll.u32 %v95_v50, 16 }
 0x1f8   :  { %v93_v51 = vpop.xlane.xlu1 %92 }
 0x1f9   :  { %v94_v53 = vcvt.f32.s32 %v93_v51 }
 0x1fb   :  { %v97_v54 = vadd.s32 %v96_v52, %v94_v53 }
 0x1fd   :  { %vm98_vm4 = vcmp.eq.s32.totalorder %v76_v38, %v97_v54  ;;  %vm99_vm5 = vcmp.eq.s32.totalorder %v77_v39, %v97_v54 }
 0x1fe   :  { %v122_v56 = vsel %vm98_vm4, 1.0, %v205_v55  ;;  %v123_v57 = vsel %vm99_vm5, 1.0, %v205_v55 }
 0x1ff   :  { %104 = vst [vmem:[#allocation7] sm:$0xff] %v122_v56  ;;  %105 = vst [vmem:[#allocation7 + $0x8] sm:$0xff] %v123_v57 }
 0x200   :  { %187 = shalt.err (!%p184_p0)
}
 0x201   :  { %115 = dma.vmem_to_hbm [thread:$0]  %s113_s1, 256, %s232_s2, [#allocation4]  }
 0x202   :  { %200 = dma.done.wait [#allocation4], 256  }
 0x203   :  { %201 = vsyncadd [#allocation4], 4294967040 }
 0x204   :  { %119 = vsyncpa [#allocation3], 1 }
 0x205   :  { %120 = vsyncpa [#allocation6], 1 }
 0x206   :  { %121 = vsyncpa [#allocation4], 1 }

</bundles_post_ra>
